<compile_context>
chip_gen: v7x
topology: tpu7x:2x2x1
jax: 0.10.0
libtpu: 0.0.40
codegen_flags: <defaults>
</compile_context>

<pallas_src>
import functools

import jax
import jax.numpy as jnp
from jax.experimental import pallas as pl
from jax.experimental.pallas import tpu as pltpu


_NEG_INF = -1e30  # large finite negative (never -inf: 0 * inf -> NaN in `picked`)


def net_head_kernel(x_ref, w_ref, b_ref, labels_ref, logits_ref, nll_ref):
    """One batch tile of the fused head + CE.

    x:      (TB, H)  bf16   CLS hidden states
    w:      (H, LP)  bf16   fused W_mlp @ W_clf, zero-padded to LP lanes
    b:      (1, LP)  f32    fused bias; padded lanes = -1e30 (mask baked in)
    labels: (TB, 1)  int32
    logits: (TB, LP) bf16   lane-dense padded logits (wrapper slices [:, :L])
    nll:    (TB, 1)  f32    per-row negative log-likelihood
    """
    logits = jnp.dot(x_ref[...], w_ref[...],
                     preferred_element_type=jnp.float32) + b_ref[...]
    logits_ref[...] = logits.astype(logits_ref.dtype)      # bf16 lane-dense slab

    tb, lp = logits.shape
    # Padded lanes carry ~-1e30 from the bias: they never win the max and
    # vanish under exp(), so no explicit mask/select is needed.
    m = jnp.max(logits, axis=-1, keepdims=True)                       # (TB, 1)
    lse = m + jnp.log(jnp.sum(jnp.exp(logits - m), axis=-1, keepdims=True))
    lane = jax.lax.broadcasted_iota(jnp.int32, (tb, lp), 1)
    one_hot = (lane == labels_ref[...]).astype(jnp.float32)          # pad lanes: 0
    picked = jnp.sum(one_hot * logits, axis=-1, keepdims=True)       # 0 * -1e30 = 0
    nll_ref[...] = lse - picked


def _choose_batch_tile(batch):
    """Pick (TB, padded batch, grid length).

    Large tiles amortize the ~0.35 us per-step overhead and approach the HBM
    roofline; TB is a multiple of 128 where possible (full MXU tiles on v5e,
    clean bf16 layout) and the grid length is kept >= 2 for medium/large
    batches so the 'parallel' axis can shard across v7x's two TensorCores.
    """
    if batch >= 1024:
        # Prefer 512; fall back to 384/256 if that wastes much less padding.
        tb = min((512, 384, 256), key=lambda t: (-(-batch // t)) * t - batch)
    elif batch >= 256:
        tb = max(128, (batch // 2) // 128 * 128)       # multiple of 128, G >= 2
    elif batch >= 32:
        tb = (-(-batch // 2) + 15) // 16 * 16          # multiple of 16, G == 2
    else:
        tb = max(8, (batch + 7) // 8 * 8)              # tiny batch: single block
    grid = -(-batch // tb)
    return tb, tb * grid, grid


def make_fused_head_params(w_mlp, b_mlp, w_clf, b_clf):
    """Fold mlp -> clf_head into one Linear and pad to a lane-dense label dim.

    Valid because Net.forward applies no nonlinearity/dropout between the two
    Linears.  Call this ONCE outside the per-batch path (frozen/eval weights),
    or inside the training step's jit so XLA fuses pad+cast into the fold —
    for a head this small, per-call weight prep would rival the kernel itself.
    Weights are in "x @ W" layout: w_mlp (H, H), w_clf (H, L).
    """
    H = w_mlp.shape[0]
    L = w_clf.shape[1]
    LP = pl.cdiv(L, 128) * 128                         # lane-dense padded labels
    w_clf32 = w_clf.astype(jnp.float32)
    w_fused = jnp.dot(w_mlp.astype(jnp.float32), w_clf32,
                      preferred_element_type=jnp.float32)
    b_fused = (jnp.dot(b_mlp.reshape(1, H).astype(jnp.float32), w_clf32,
                       preferred_element_type=jnp.float32)
               + b_clf.reshape(1, L).astype(jnp.float32))
    w_fused = jnp.pad(w_fused, ((0, 0), (0, LP - L))).astype(jnp.bfloat16)
    # Bake the padded-lane mask into the bias: padded lanes get a large finite
    # negative, so the kernel's max/LSE ignores them with zero mask work.
    b_fused = jnp.pad(b_fused, ((0, 0), (0, LP - L)),
                      constant_values=_NEG_INF).astype(jnp.float32)
    return w_fused, b_fused


@functools.partial(jax.jit, static_argnames=("num_labels",))
def net_head(last_hidden, w_fused, b_fused, labels, *, num_labels):
    """Fused classification head + CrossEntropy('mean').  Returns (loss, logits)."""
    B, H = last_hidden.shape
    LP = w_fused.shape[1]
    L = num_labels
    TB, B_pad, G = _choose_batch_tile(B)

    x = last_hidden.astype(jnp.bfloat16)
    labels2d = labels.reshape(B, 1).astype(jnp.int32)
    if B_pad != B:  # ragged batch: zero-pad rows; they are excluded from the loss
        x = jnp.pad(x, ((0, B_pad - B), (0, 0)))
        labels2d = jnp.pad(labels2d, ((0, B_pad - B), (0, 0)))

    cost = pl.CostEstimate(
        flops=2 * B_pad * H * LP + 8 * B_pad * LP,
        transcendentals=B_pad * (LP + 1),
        bytes_accessed=(B_pad * H * 2            # x (bf16)
                        + H * LP * 2 + LP * 4    # fused W (bf16) + bias (f32)
                        + B_pad * 4              # labels
                        + B_pad * LP * 2         # logits out (bf16)
                        + B_pad * 4),            # nll out (f32)
    )

    logits_pad, nll = pl.pallas_call(
        net_head_kernel,
        out_shape=(jax.ShapeDtypeStruct((B_pad, LP), jnp.bfloat16),
                   jax.ShapeDtypeStruct((B_pad, 1), jnp.float32)),
        grid_spec=pltpu.PrefetchScalarGridSpec(
            num_scalar_prefetch=0,
            grid=(G,),
            in_specs=[
                pl.BlockSpec((TB, H), lambda i: (i, 0)),    # x tile (pipelined)
                pl.BlockSpec((H, LP), lambda i: (0, 0)),    # fused W (VMEM-resident)
                pl.BlockSpec((1, LP), lambda i: (0, 0)),    # fused b (VMEM-resident)
                pl.BlockSpec((TB, 1), lambda i: (i, 0)),    # labels tile
            ],
            out_specs=(
                pl.BlockSpec((TB, LP), lambda i: (i, 0)),   # lane-dense bf16 logits
                pl.BlockSpec((TB, 1), lambda i: (i, 0)),    # per-row NLL
            ),
        ),
        compiler_params=pltpu.CompilerParams(
            dimension_semantics=("parallel",)),             # 2-TC sharding on v7x
        cost_estimate=cost,
    )(x, w_fused, b_fused, labels2d)

    loss = jnp.sum(nll[:B, 0]) * (1.0 / B)        # CE 'mean' over the real rows
    logits = logits_pad[:B, :L].astype(jnp.float32)
    return loss, logits


if __name__ == "__main__":
    # Small synthetic shapes: batch=8, hidden=32, num_labels=4.
    B, H, L = 8, 32, 4
    key = jax.random.PRNGKey(0)
    k_x, k_wm, k_bm, k_wc, k_bc, k_lab = jax.random.split(key, 6)

    # Stand-in for bert_output.last_hidden_state[:, 0]
    last_hidden = jax.random.normal(k_x, (B, H), jnp.float32)

    # nn.Linear-like parameters in x @ W layout (modest scale).
    w_mlp = jax.random.normal(k_wm, (H, H), jnp.float32) * 0.1
    b_mlp = jax.random.normal(k_bm, (H,), jnp.float32) * 0.1
    w_clf = jax.random.normal(k_wc, (H, L), jnp.float32) * 0.1
    b_clf = jax.random.normal(k_bc, (L,), jnp.float32) * 0.1
    labels = jax.random.randint(k_lab, (B,), 0, L, jnp.int32)

    # Weight prep (fold + pad + cast) done once, outside the per-batch path.
    w_fused, b_fused = make_fused_head_params(w_mlp, b_mlp, w_clf, b_clf)

    loss, logits = net_head(last_hidden, w_fused, b_fused, labels, num_labels=L)
    jax.block_until_ready((loss, logits))

    # Pure-JAX f32 reference of the two-linear head + CE(mean) loss.
    ref_logits = (last_hidden @ w_mlp + b_mlp) @ w_clf + b_clf
    ref_lse = jax.scipy.special.logsumexp(ref_logits, axis=-1)
    ref_loss = jnp.mean(ref_lse - ref_logits[jnp.arange(B), labels])

    # bf16 operands + folded weights + bf16 logits store vs. f32 reference.
    assert jnp.allclose(logits, ref_logits, atol=2e-2, rtol=2e-2), (
        float(jnp.max(jnp.abs(logits - ref_logits))))
    assert jnp.allclose(loss, ref_loss, atol=2e-2, rtol=2e-2), (
        float(loss), float(ref_loss))

    print("KERNEL_OK")
</pallas_src>

<mosaic_0001>
module attributes {stable_mosaic.version = 11 : i64} {
  func.func @net_head_kernel(%arg0: i32, %arg1: memref<8x32xbf16, #tpu.memory_space<vmem>>, %arg2: memref<32x128xbf16, #tpu.memory_space<vmem>>, %arg3: memref<1x128xf32, #tpu.memory_space<vmem>>, %arg4: memref<8x1xi32, #tpu.memory_space<vmem>>, %arg5: memref<8x128xbf16, #tpu.memory_space<vmem>>, %arg6: memref<8x1xf32, #tpu.memory_space<vmem>>) attributes {dimension_semantics = [#tpu.dimension_semantics<parallel>], iteration_bounds = array<i64: 1>, scalar_prefetch = 0 : i64, scratch_operands = 0 : i64, tpu.core_type = #tpu.core_type<tc>, window_params = [{transform_indices = @transform_0, window_bounds = array<i64: 8, 32>}, {pipeline_mode = #tpu.pipeline_mode<synchronous>, transform_indices = @transform_1, window_bounds = array<i64: 32, 128>}, {pipeline_mode = #tpu.pipeline_mode<synchronous>, transform_indices = @transform_2, window_bounds = array<i64: 1, 128>}, {transform_indices = @transform_3, window_bounds = array<i64: 8, 1>}, {transform_indices = @transform_4, window_bounds = array<i64: 8, 128>}, {transform_indices = @transform_5, window_bounds = array<i64: 8, 1>}]} {
    %c0 = arith.constant 0 : index
    %c0_0 = arith.constant 0 : index
    %0 = vector.load %arg1[%c0, %c0_0] : memref<8x32xbf16, #tpu.memory_space<vmem>>, vector<8x32xbf16>
    %c0_1 = arith.constant 0 : index
    %c0_2 = arith.constant 0 : index
    %1 = vector.load %arg2[%c0_1, %c0_2] : memref<32x128xbf16, #tpu.memory_space<vmem>>, vector<32x128xbf16>
    %cst = arith.constant dense<0.000000e+00> : vector<8x128xf32>
    %2 = tpu.matmul %0, %1, %cst {dimension_numbers = #tpu.dot_dimension_numbers<[1], [0], [0], [1], [0, 0, 1, 1], [], []>} : vector<8x32xbf16>, vector<32x128xbf16>, vector<8x128xf32> -> vector<8x128xf32>
    %c0_3 = arith.constant 0 : index
    %c0_4 = arith.constant 0 : index
    %3 = vector.load %arg3[%c0_3, %c0_4] : memref<1x128xf32, #tpu.memory_space<vmem>>, vector<1x128xf32>
    %4 = vector.broadcast %3 : vector<1x128xf32> to vector<8x128xf32>
    %5 = arith.addf %2, %4 : vector<8x128xf32>
    %6 = arith.truncf %5 : vector<8x128xf32> to vector<8x128xbf16>
    %c0_5 = arith.constant 0 : index
    %c0_6 = arith.constant 0 : index
    %7 = vector.load %arg5[%c0_5, %c0_6] : memref<8x128xbf16, #tpu.memory_space<vmem>>, vector<8x128xbf16>
    tpu.vector_store %arg5[%c0_5, %c0_6], %6 {strides = array<i32>} : memref<8x128xbf16, #tpu.memory_space<vmem>>, vector<8x128xbf16>,
    %cst_7 = arith.constant dense<0xFF800000> : vector<8xf32>
    %8 = vector.multi_reduction <maximumf>, %5, %cst_7 [1] : vector<8x128xf32> to vector<8xf32>
    %9 = vector.shape_cast %8 : vector<8xf32> to vector<8x1xf32>
    %10 = vector.broadcast %9 : vector<8x1xf32> to vector<8x128xf32>
    %11 = arith.subf %5, %10 : vector<8x128xf32>
    %12 = math.exp %11 : vector<8x128xf32>
    %cst_8 = arith.constant dense<0.000000e+00> : vector<8xf32>
    %13 = vector.multi_reduction <add>, %12, %cst_8 [1] : vector<8x128xf32> to vector<8xf32>
    %14 = vector.shape_cast %13 : vector<8xf32> to vector<8x1xf32>
    %15 = math.log %14 : vector<8x1xf32>
    %16 = arith.addf %9, %15 : vector<8x1xf32>
    %17 = tpu.iota {dimensions = array<i32: 1>} : vector<8x128xi32>
    %c0_9 = arith.constant 0 : index
    %c0_10 = arith.constant 0 : index
    %18 = vector.load %arg4[%c0_9, %c0_10] : memref<8x1xi32, #tpu.memory_space<vmem>>, vector<8x1xi32>
    %19 = vector.broadcast %18 : vector<8x1xi32> to vector<8x128xi32>
    %20 = arith.cmpi eq, %17, %19 : vector<8x128xi32>
    %21 = arith.extui %20 : vector<8x128xi1> to vector<8x128xi32>
    %22 = arith.sitofp %21 : vector<8x128xi32> to vector<8x128xf32>
    %23 = arith.mulf %22, %5 : vector<8x128xf32>
    %cst_11 = arith.constant dense<0.000000e+00> : vector<8xf32>
    %24 = vector.multi_reduction <add>, %23, %cst_11 [1] : vector<8x128xf32> to vector<8xf32>
    %25 = vector.shape_cast %24 : vector<8xf32> to vector<8x1xf32>
    %26 = arith.subf %16, %25 : vector<8x1xf32>
    %c0_12 = arith.constant 0 : index
    %c0_13 = arith.constant 0 : index
    %27 = vector.load %arg6[%c0_12, %c0_13] : memref<8x1xf32, #tpu.memory_space<vmem>>, vector<8x1xf32>
    tpu.vector_store %arg6[%c0_12, %c0_13], %26 {strides = array<i32>} : memref<8x1xf32, #tpu.memory_space<vmem>>, vector<8x1xf32>,
    return
  }
  func.func @transform_0(%arg0: i32) -> (i32, i32) {
    %c0_i32 = arith.constant 0 : i32
    %c0_i32_0 = arith.constant 0 : i32
    return %arg0, %c0_i32 : i32, i32
  }
  func.func @transform_1(%arg0: i32) -> (i32, i32) {
    %c0_i32 = arith.constant 0 : i32
    %c0_i32_0 = arith.constant 0 : i32
    %c0_i32_1 = arith.constant 0 : i32
    return %c0_i32, %c0_i32_0 : i32, i32
  }
  func.func @transform_2(%arg0: i32) -> (i32, i32) {
    %c0_i32 = arith.constant 0 : i32
    %c0_i32_0 = arith.constant 0 : i32
    %c0_i32_1 = arith.constant 0 : i32
    return %c0_i32, %c0_i32_0 : i32, i32
  }
  func.func @transform_3(%arg0: i32) -> (i32, i32) {
    %c0_i32 = arith.constant 0 : i32
    %c0_i32_0 = arith.constant 0 : i32
    return %arg0, %c0_i32 : i32, i32
  }
  func.func @transform_4(%arg0: i32) -> (i32, i32) {
    %c0_i32 = arith.constant 0 : i32
    %c0_i32_0 = arith.constant 0 : i32
    return %arg0, %c0_i32 : i32, i32
  }
  func.func @transform_5(%arg0: i32) -> (i32, i32) {
    %c0_i32 = arith.constant 0 : i32
    %c0_i32_0 = arith.constant 0 : i32
    return %arg0, %c0_i32 : i32, i32
  }
}

</mosaic_0001>

<bundles_post_ra>
// kernel: net_head.1
= control target key start
LH: loop header
LB: loop body
LE: loop exit
PB: predicated region body
PF: predicated region fallthrough
CT: control target
= control target key end

     0   :  { %v149_v0 = vmov 0.0   ;;  %vm150_vm0 = vmmov 0   ;;  %vm44_vm1 = vcmask 261120   ;;  %v151_v4 = vmov 0   ;;  %s203_s1 = inlined_call_operand.vmem [shape: bf16[32,128], index: 1, kind: input, shape index: {}]   ;;  %s204_s0 = inlined_call_operand.vmem [shape: bf16[8,32], index: 0, kind: input, shape index: {}]   ;;  %s205_s2 = inlined_call_operand.vmem [shape: f32[1,128], index: 2, kind: input, shape index: {}]   ;;  %s206_s4 = inlined_call_operand.vmem [shape: bf16[8,128], index: 4, kind: output, shape index: {0}]   ;;  %s207_s3 = inlined_call_operand.vmem [shape: s32[8,1], index: 3, kind: input, shape index: {}]   ;;  %s208_s5 = inlined_call_operand.vmem [shape: f32[8,1], index: 5, kind: output, shape index: {1}]  }
   0x1   :  { %131 = vmatprep.subr.bf16.mxu0 %v149_v0  ;;  %v143_v1 = vld [vmem:[%s203_s1] sm:$0xff]   ;;  %135 = vmatprep.mubr.msk.bf16.mxu0 %vm150_vm0, %v149_v0  ;;  %v144_v2 = vld [vmem:[%s203_s1 + $0x8] sm:$0xff]   ;;  %v100_v16 = vlaneseq  ;;  %vm113_vm3 = vcmask 7168  }
   0x2   :  { %132 = vmatpush3.bf16.msra.mxu0 %v143_v1  ;;  %v20_v3 = vld [vmem:[%s204_s0] sm:$0xf]  ;;  %142 = vset.pattern.permute.xlu0 %v151_v4 }
   0x3   :  { %133 = vmatprep.subr.bf16.mxu0 %v149_v0  ;;  %v123_v5 = vld [vmem:[%s205_s2] ss:$0 sm:$0xff]  ;;  %v101_v17 = vand.u32 127, %v100_v16 }
   0x4   :  { %v102_v12 = vld [vmem:[%s207_s3] sm:$0xff] }
   0x6   :  { %134 = vmatpush3.bf16.msra.mxu0 %v144_v2 }
   0x9   :  { %136 = vmatmul.mubr.msk.bf16.vlgmr.msra.gmra.mrb[0].mxu0 %vm44_vm1, %v20_v3 }
  0xdc   :  { %v82_v6 = vpop.f32.mrb[0].mxu0 }
  0xdd   :  { %v83_v7 = vadd.f32 %v123_v5, %v82_v6  ;;  %v137_v8 = vpop.f32.mrb[1].mxu0 }
  0xde   :  { %v85_v9 = vpop.f32.mrb[2].mxu0 }
  0xdf   :  { %v88_v10 = vpack.c.bf16 %v83_v7, %v83_v7  ;;  %90 = vmax.xlane.f32.xlu0 %v83_v7  ;;  %v138_v11 = vpop.f32.mrb[3].mxu0 }
  0xe1   :  { %89 = vst [vmem:[%s206_s4] sm:$0xf] %v88_v10 }
  0xf5   :  { %104 = vperm.xlu0 %142, %v102_v12  }
 0x16c   :  { %v91_v13 = vpop.xlane.xlu0 %90 }
 0x16d   :  { %v92_v14 = vsub.f32 %v83_v7, %v91_v13 }
 0x16f   :  { %v93_v15 = vmul.f32 1.442695, %v92_v14 }
 0x171   :  { %145 = vpow2.f32 %v93_v15 }
 0x174   :  { %v105_v18 = vpop.permute.xlu0 %104 }
 0x175   :  { %vm106_vm2 = vcmp.eq.s32.totalorder %v101_v17, %v105_v18 }
 0x176   :  { %v127_v20 = vsel %vm106_vm2, 1.0, %v149_v0 }
 0x177   :  { %v109_v21 = vmul.f32 %v127_v20, %v83_v7 }
 0x17b   :  { %v146_v19 = vpop.eup %145 }
 0x17c   :  { %95 = vadd.xlane.f32.xlu1 %v146_v19 }
 0x180   :  { %110 = vadd.xlane.f32.xlu1 %v109_v21 }
 0x209   :  { %v96_v22 = vpop.xlane.xlu1 %95 }
 0x20a   :  { %147 = vlog2.f32 %v96_v22 }
 0x20d   :  { %v111_v26 = vpop.xlane.xlu1 %110 }
 0x214   :  { %v148_v23 = vpop.eup %147 }
 0x215   :  { %v98_v24 = vmul.f32 0.6931472, %v148_v23 }
 0x217   :  { %v99_v25 = vadd.f32 %v98_v24, %v91_v13 }
 0x219   :  { %v112_v27 = vsub.f32 %v99_v25, %v111_v26 }
 0x21b   :  { %114 = vst.msk [vmem:[%s208_s5] sm:$0xff] %vm113_vm3, %v112_v27 }

</bundles_post_ra>
